<compile_context>
chip_gen: v7x
topology: tpu7x:2x2x1
jax: 0.10.0
libtpu: 0.0.40
codegen_flags: <defaults>
</compile_context>

<pallas_src>
import functools

import jax
import jax.numpy as jnp
from jax.experimental import pallas as pl
from jax.experimental.pallas import tpu as pltpu


def _round_up(v, m):
    return ((v + m - 1) // m) * m


def _pad2(a, rows, cols, dtype):
    out = jnp.zeros((rows, cols), dtype)
    return out.at[: a.shape[0], : a.shape[1]].set(a.astype(dtype))


# ----------------------------------------------------------------------------
# Adjacency build (plain XLA scatter; int8 to skip the f32 N^2 intermediate).
# ----------------------------------------------------------------------------
def build_adjacency(edge_index, num_nodes, n_pad):
    """Returns ((A+I) as int8 [n_pad, n_pad], D^{-1/2} as f32 [n_pad, 1]).

    A[target, source] += 1 per edge (duplicates accumulate, matching PyG message
    summation); the diagonal is then SET to 1 for real nodes, matching PyG's
    add_remaining_self_loops (no weight-2 diagonal for pre-existing self-loops).
    Counts > 127 per (target, source) pair would overflow int8 (degenerate case).
    """
    src = edge_index[0].astype(jnp.int32)
    dst = edge_index[1].astype(jnp.int32)
    adj = jnp.zeros((n_pad, n_pad), jnp.int8).at[dst, src].add(1)
    diag = jnp.arange(num_nodes, dtype=jnp.int32)
    adj = adj.at[diag, diag].set(1)
    deg = jnp.sum(adj, axis=1, dtype=jnp.float32).reshape(n_pad, 1)
    dinv = jnp.where(deg > 0, jax.lax.rsqrt(deg), 0.0).astype(jnp.float32)
    return adj, dinv


# ----------------------------------------------------------------------------
# Fused two-layer kernel: (A+I) resident in VMEM, both layers in one launch.
# ----------------------------------------------------------------------------
def fused_vgcn_kernel(a_ref, xs_ref, w1_ref, b1_ref, w2_ref, b2_ref, dinv_ref, o_ref):
    a = a_ref[...].astype(jnp.bfloat16)     # int8 counts -> bf16 (exact up to 256)
    dinv = dinv_ref[...]                    # [Np, 1] f32 (D^-1/2, 0 on padded rows)

    # layer 1: h1 = relu(D^-1/2 (A+I) (D^-1/2 X) W1^T + b1)   (col scale pre-folded into xs)
    h = jnp.dot(xs_ref[...], w1_ref[...], preferred_element_type=jnp.float32)
    y = jnp.dot(a, h.astype(jnp.bfloat16), preferred_element_type=jnp.float32)
    h1 = jnp.maximum(y * dinv + b1_ref[...], 0.0)

    # fused mu/logstd head: z = D^-1/2 (A+I) (D^-1/2 h1) W2^T + b2
    g = (h1 * dinv).astype(jnp.bfloat16)
    h2 = jnp.dot(g, w2_ref[...], preferred_element_type=jnp.float32)
    y2 = jnp.dot(a, h2.astype(jnp.bfloat16), preferred_element_type=jnp.float32)
    o_ref[...] = (y2 * dinv + b2_ref[...]).astype(o_ref.dtype)


def _fused_call(adj_i8, xs, w1p, b1p, w2p, b2p, dinv, vmem_limit):
    n_pad = adj_i8.shape[0]
    c2_pad = w2p.shape[1]
    return pl.pallas_call(
        fused_vgcn_kernel,
        out_shape=jax.ShapeDtypeStruct((n_pad, c2_pad), jnp.float32),
        in_specs=[pl.BlockSpec(memory_space=pltpu.MemorySpace.VMEM) for _ in range(7)],
        out_specs=pl.BlockSpec(memory_space=pltpu.MemorySpace.VMEM),
        compiler_params=pltpu.CompilerParams(vmem_limit_bytes=vmem_limit),
    )(adj_i8, xs, w1p, b1p, w2p, b2p, dinv)


# ----------------------------------------------------------------------------
# Tiled per-layer kernel (streaming A from HBM) for graphs too large to fuse.
# ----------------------------------------------------------------------------
def gcn_layer_kernel(a_ref, x_ref, w_ref, di_ref, b_ref, o_ref, acc_ref,
                     *, apply_relu, scale_out):
    """One (row-tile i, K-tile k) step of  D^-1/2 (A+I) (X_scaled W^T) + b  [+relu][*D^-1/2].

    a_ref : [TM, TK] int8   (A+I) tile (counts) -> cast to bf16 in-kernel
    x_ref : [TK, Cin] bf16  features, column-side D^-1/2 already folded in
    w_ref : [Cin, Cp] bf16  W^T (lane-padded)
    di_ref: [TM, 1]  f32    D^-1/2 for the output (row) nodes
    b_ref : [1, Cp]  f32    bias (lane-padded)
    """
    k = pl.program_id(1)

    @pl.when(k == 0)
    def _():
        acc_ref[...] = jnp.zeros_like(acc_ref)

    # Feature transform for this K-tile (tiny Cin -> cheap MXU filler; avoids
    # re-streaming a full [N, Cp] h from HBM per row tile).
    h = jnp.dot(x_ref[...], w_ref[...], preferred_element_type=jnp.float32)
    a = a_ref[...].astype(jnp.bfloat16)           # int8 -> bf16 (VALU has slack)
    acc_ref[...] += jnp.dot(a, h.astype(jnp.bfloat16),
                            preferred_element_type=jnp.float32)

    @pl.when(k == pl.num_programs(1) - 1)
    def _():
        out = acc_ref[...] * di_ref[...] + b_ref[...]     # row-side D^-1/2 + bias
        if apply_relu:
            out = jnp.maximum(out, 0.0)
        if scale_out:                                     # fold next layer's column scale
            out = out * di_ref[...]
        o_ref[...] = out.astype(o_ref.dtype)


def gcn_layer(adj_i8, x_scaled, weight_t, dinv, bias, *, apply_relu, scale_out,
              out_dtype, tile, vmem_limit):
    n_pad = adj_i8.shape[0]
    c_in = x_scaled.shape[1]
    c_out_pad = weight_t.shape[1]
    tm = tk = tile
    grid = (n_pad // tm, n_pad // tk)

    return pl.pallas_call(
        functools.partial(gcn_layer_kernel, apply_relu=apply_relu, scale_out=scale_out),
        out_shape=jax.ShapeDtypeStruct((n_pad, c_out_pad), out_dtype),
        grid_spec=pltpu.PrefetchScalarGridSpec(
            num_scalar_prefetch=0,
            grid=grid,
            in_specs=[
                pl.BlockSpec((tm, tk), lambda i, k: (i, k)),              # (A+I) int8
                pl.BlockSpec((tk, c_in), lambda i, k: (k, 0)),            # features
                pl.BlockSpec((c_in, c_out_pad), lambda i, k: (0, 0)),     # W^T
                pl.BlockSpec((tm, 1), lambda i, k: (i, 0)),               # D^-1/2 rows
                pl.BlockSpec((1, c_out_pad), lambda i, k: (0, 0)),        # bias
            ],
            out_specs=pl.BlockSpec((tm, c_out_pad), lambda i, k: (i, 0)),
            scratch_shapes=[pltpu.VMEM((tm, c_out_pad), jnp.float32)],
        ),
        compiler_params=pltpu.CompilerParams(
            dimension_semantics=("parallel", "arbitrary"),   # rows across TCs (v7x)
            vmem_limit_bytes=vmem_limit,
        ),
    )(adj_i8, x_scaled, weight_t, dinv, bias)


# ----------------------------------------------------------------------------
# Tile / padding selection.
# ----------------------------------------------------------------------------
def _tiled_limits():
    """Generation-aware tile ceiling: v7x (64 MiB VMEM) caps at 2048 / 48 MiB,
    v5e/v6e (128 MiB VMEM) can take 4096 / 96 MiB."""
    max_tile, vmem_limit = 2048, 48 * 1024 * 1024
    try:
        info = pltpu.get_tpu_info()
        if getattr(info, "vmem_capacity_bytes", 0) >= 100 * 1024 * 1024:
            max_tile, vmem_limit = 4096, 96 * 1024 * 1024
    except Exception:
        pass
    return max_tile, vmem_limit


def _choose_tiling(n, max_tile):
    """n_pad is decoupled from the tile: start from round_up(n, 128) and only grow
    the tile when it does not inflate the O(N^2) adjacency stream by > ~30%."""
    base = _round_up(max(n, 1), 128)
    tile, n_pad = 128, base
    t = 256
    while t <= max_tile:
        padded = _round_up(max(n, 1), t)
        if padded * padded <= int(1.3 * base * base):
            tile, n_pad = t, padded
        t *= 2
    return tile, n_pad


# ----------------------------------------------------------------------------
# Full VariationalGCNEncoder forward.
# ----------------------------------------------------------------------------
def variational_gcn_encoder_forward(x, edge_index, params, *, use_fused=None):
    """x: [N, C_in] f32, edge_index: [2, E] int32.
    params = (w1_t, b1, wmu_t, bmu, wls_t, bls); weight_t's are [C_in, C_out] (= W^T)."""
    w1_t, b1, wmu_t, bmu, wls_t, bls = params
    n, c_in = x.shape
    c_hid = w1_t.shape[1]
    c_lat = wmu_t.shape[1]
    c_hid_pad = _round_up(c_hid, 128)
    c2 = 2 * c_lat
    c2_pad = _round_up(c2, 128)

    # fuse mu / logstd into one lane-dense head (adjacency reused for both outputs)
    w2_t = jnp.concatenate([wmu_t, wls_t], axis=1)
    b2 = jnp.concatenate([bmu, bls], axis=0)

    n_pad128 = _round_up(max(n, 1), 128)
    if use_fused is None:
        use_fused = (n_pad128 <= 2048) and (c_hid_pad <= 512) and (c2_pad <= 512)

    if use_fused:
        tile, n_pad, vmem_limit = None, n_pad128, 48 * 1024 * 1024
    else:
        max_tile, vmem_limit = _tiled_limits()
        tile, n_pad = _choose_tiling(n, max_tile)

    adj_i8, dinv = build_adjacency(edge_index, n, n_pad)

    # column-side D^{-1/2} folded into the (bf16) feature matrix
    x_pad = jnp.zeros((n_pad, c_in), jnp.float32).at[:n].set(x.astype(jnp.float32))
    xs = (x_pad * dinv).astype(jnp.bfloat16)

    w1p = _pad2(w1_t, c_in, c_hid_pad, jnp.bfloat16)
    b1p = _pad2(b1.reshape(1, -1), 1, c_hid_pad, jnp.float32)
    w2p = _pad2(w2_t, c_hid_pad, c2_pad, jnp.bfloat16)
    b2p = _pad2(b2.reshape(1, -1), 1, c2_pad, jnp.float32)

    if use_fused:
        z = _fused_call(adj_i8, xs, w1p, b1p, w2p, b2p, dinv, vmem_limit)
    else:
        # layer 1 emits g = D^-1/2 * relu(conv1) in bf16, lane-padded -> feeds layer 2 directly
        g = gcn_layer(adj_i8, xs, w1p, dinv, b1p, apply_relu=True, scale_out=True,
                      out_dtype=jnp.bfloat16, tile=tile, vmem_limit=vmem_limit)
        z = gcn_layer(adj_i8, g, w2p, dinv, b2p, apply_relu=False, scale_out=False,
                      out_dtype=jnp.float32, tile=tile, vmem_limit=vmem_limit)

    return z[:n, :c_lat], z[:n, c_lat:c2]


if __name__ == "__main__":
    key = jax.random.PRNGKey(0)
    N, C_IN, C_LAT, E = 16, 8, 16, 40
    C_HID = 2 * C_LAT  # conv1 output channels

    keys = jax.random.split(key, 6)
    x = jax.random.normal(keys[0], (N, C_IN), dtype=jnp.float32)
    src = jax.random.randint(keys[1], (E,), 0, N, dtype=jnp.int32)
    dst = jax.random.randint(keys[2], (E,), 0, N, dtype=jnp.int32)
    edge_index = jnp.stack([src, dst], axis=0)

    def glorot_t(k, fan_in, fan_out):
        lim = (6.0 / (fan_in + fan_out)) ** 0.5
        return jax.random.uniform(k, (fan_in, fan_out), minval=-lim, maxval=lim,
                                  dtype=jnp.float32)

    w1_t = glorot_t(keys[3], C_IN, C_HID)
    b1 = jnp.zeros((C_HID,), jnp.float32)
    wmu_t = glorot_t(keys[4], C_HID, C_LAT)
    bmu = jnp.zeros((C_LAT,), jnp.float32)
    wls_t = glorot_t(keys[5], C_HID, C_LAT)
    bls = jnp.zeros((C_LAT,), jnp.float32)
    params = (w1_t, b1, wmu_t, bmu, wls_t, bls)

    # fused (A VMEM-resident, single launch) path -- used for this graph size
    mu, logstd = variational_gcn_encoder_forward(x, edge_index, params)
    # tiled streaming path (what larger graphs use) -- also exercised for coverage
    mu_t, logstd_t = variational_gcn_encoder_forward(x, edge_index, params, use_fused=False)
    jax.block_until_ready((mu, logstd, mu_t, logstd_t))

    # pure-JAX f32 reference (PyG gcn_norm semantics: exactly one self-loop per node)
    adj = jnp.zeros((N, N), jnp.float32).at[dst, src].add(1.0)
    idx = jnp.arange(N)
    adj = adj.at[idx, idx].set(1.0)
    deg = adj.sum(axis=1)
    dinv = jnp.where(deg > 0, 1.0 / jnp.sqrt(deg), 0.0)
    a_hat = dinv[:, None] * adj * dinv[None, :]
    h1_ref = jnp.maximum(a_hat @ (x @ w1_t) + b1[None, :], 0.0)
    mu_ref = a_hat @ (h1_ref @ wmu_t) + bmu[None, :]
    ls_ref = a_hat @ (h1_ref @ wls_t) + bls[None, :]

    assert mu.shape == (N, C_LAT) and logstd.shape == (N, C_LAT)
    # bf16 MXU inputs with f32 accumulation -> loose-ish tolerance vs f32 reference
    for got, ref in ((mu, mu_ref), (logstd, ls_ref), (mu_t, mu_ref), (logstd_t, ls_ref)):
        assert jnp.allclose(got, ref, atol=5e-2, rtol=5e-2), \
            float(jnp.max(jnp.abs(got - ref)))

    print("KERNEL_OK")
</pallas_src>

<mosaic_0001>
module attributes {stable_mosaic.version = 11 : i64} {
  func.func @fused_vgcn_kernel(%arg0: memref<128x128xi8, #tpu.memory_space<vmem>>, %arg1: memref<128x8xbf16, #tpu.memory_space<vmem>>, %arg2: memref<8x128xbf16, #tpu.memory_space<vmem>>, %arg3: memref<1x128xf32, #tpu.memory_space<vmem>>, %arg4: memref<128x128xbf16, #tpu.memory_space<vmem>>, %arg5: memref<1x128xf32, #tpu.memory_space<vmem>>, %arg6: memref<128x1xf32, #tpu.memory_space<vmem>>, %arg7: memref<128x128xf32, #tpu.memory_space<vmem>>) attributes {dimension_semantics = [], scalar_prefetch = 0 : i64, scratch_operands = 0 : i64, tpu.core_type = #tpu.core_type<tc>} {
    %c0 = arith.constant 0 : index
    %c0_0 = arith.constant 0 : index
    %0 = vector.load %arg0[%c0, %c0_0] : memref<128x128xi8, #tpu.memory_space<vmem>>, vector<128x128xi8>
    %1 = arith.sitofp %0 : vector<128x128xi8> to vector<128x128xbf16>
    %c0_1 = arith.constant 0 : index
    %c0_2 = arith.constant 0 : index
    %2 = vector.load %arg6[%c0_1, %c0_2] : memref<128x1xf32, #tpu.memory_space<vmem>>, vector<128x1xf32>
    %c0_3 = arith.constant 0 : index
    %c0_4 = arith.constant 0 : index
    %3 = vector.load %arg1[%c0_3, %c0_4] : memref<128x8xbf16, #tpu.memory_space<vmem>>, vector<128x8xbf16>
    %c0_5 = arith.constant 0 : index
    %c0_6 = arith.constant 0 : index
    %4 = vector.load %arg2[%c0_5, %c0_6] : memref<8x128xbf16, #tpu.memory_space<vmem>>, vector<8x128xbf16>
    %cst = arith.constant dense<0.000000e+00> : vector<128x128xf32>
    %5 = tpu.matmul %3, %4, %cst {dimension_numbers = #tpu.dot_dimension_numbers<[1], [0], [0], [1], [0, 0, 1, 1], [], []>} : vector<128x8xbf16>, vector<8x128xbf16>, vector<128x128xf32> -> vector<128x128xf32>
    %6 = arith.truncf %5 : vector<128x128xf32> to vector<128x128xbf16>
    %cst_7 = arith.constant dense<0.000000e+00> : vector<128x128xf32>
    %7 = tpu.matmul %1, %6, %cst_7 {dimension_numbers = #tpu.dot_dimension_numbers<[1], [0], [0], [1], [0, 0, 1, 1], [], []>} : vector<128x128xbf16>, vector<128x128xbf16>, vector<128x128xf32> -> vector<128x128xf32>
    %8 = vector.broadcast %2 : vector<128x1xf32> to vector<128x128xf32>
    %9 = arith.mulf %7, %8 : vector<128x128xf32>
    %c0_8 = arith.constant 0 : index
    %c0_9 = arith.constant 0 : index
    %10 = vector.load %arg3[%c0_8, %c0_9] : memref<1x128xf32, #tpu.memory_space<vmem>>, vector<1x128xf32>
    %11 = vector.broadcast %10 : vector<1x128xf32> to vector<128x128xf32>
    %12 = arith.addf %9, %11 : vector<128x128xf32>
    %cst_10 = arith.constant 0.000000e+00 : f32
    %13 = vector.broadcast %cst_10 : f32 to vector<128x128xf32>
    %14 = arith.maximumf %12, %13 : vector<128x128xf32>
    %15 = vector.broadcast %2 : vector<128x1xf32> to vector<128x128xf32>
    %16 = arith.mulf %14, %15 : vector<128x128xf32>
    %17 = arith.truncf %16 : vector<128x128xf32> to vector<128x128xbf16>
    %c0_11 = arith.constant 0 : index
    %c0_12 = arith.constant 0 : index
    %18 = vector.load %arg4[%c0_11, %c0_12] : memref<128x128xbf16, #tpu.memory_space<vmem>>, vector<128x128xbf16>
    %cst_13 = arith.constant dense<0.000000e+00> : vector<128x128xf32>
    %19 = tpu.matmul %17, %18, %cst_13 {dimension_numbers = #tpu.dot_dimension_numbers<[1], [0], [0], [1], [0, 0, 1, 1], [], []>} : vector<128x128xbf16>, vector<128x128xbf16>, vector<128x128xf32> -> vector<128x128xf32>
    %20 = arith.truncf %19 : vector<128x128xf32> to vector<128x128xbf16>
    %cst_14 = arith.constant dense<0.000000e+00> : vector<128x128xf32>
    %21 = tpu.matmul %1, %20, %cst_14 {dimension_numbers = #tpu.dot_dimension_numbers<[1], [0], [0], [1], [0, 0, 1, 1], [], []>} : vector<128x128xbf16>, vector<128x128xbf16>, vector<128x128xf32> -> vector<128x128xf32>
    %22 = vector.broadcast %2 : vector<128x1xf32> to vector<128x128xf32>
    %23 = arith.mulf %21, %22 : vector<128x128xf32>
    %c0_15 = arith.constant 0 : index
    %c0_16 = arith.constant 0 : index
    %24 = vector.load %arg5[%c0_15, %c0_16] : memref<1x128xf32, #tpu.memory_space<vmem>>, vector<1x128xf32>
    %25 = vector.broadcast %24 : vector<1x128xf32> to vector<128x128xf32>
    %26 = arith.addf %23, %25 : vector<128x128xf32>
    %c0_17 = arith.constant 0 : index
    %c0_18 = arith.constant 0 : index
    %27 = vector.load %arg7[%c0_17, %c0_18] : memref<128x128xf32, #tpu.memory_space<vmem>>, vector<128x128xf32>
    tpu.vector_store %arg7[%c0_17, %c0_18], %26 {strides = array<i32>} : memref<128x128xf32, #tpu.memory_space<vmem>>, vector<128x128xf32>,
    return
  }
}

</mosaic_0001>

<bundles_post_ra>
// kernel: tpu_custom_call.1
= control target key start
LH: loop header
LB: loop body
LE: loop exit
PB: predicated region body
PF: predicated region fallthrough
CT: control target
= control target key end

     0   :  { %vm138_vm0 = vcmask 1043456   ;;  %vm113_vm1 = vcmask 64512   ;;  %s1441_s0 = inlined_call_operand.vmem [shape: s8[128,128], index: 0, kind: input, shape index: {}]   ;;  %s1442_s1 = inlined_call_operand.vmem [shape: bf16[128,8], index: 1, kind: input, shape index: {}]   ;;  %s1443_s2 = inlined_call_operand.vmem [shape: bf16[8,128], index: 2, kind: input, shape index: {}]   ;;  %s1444_s3 = inlined_call_operand.vmem [shape: f32[1,128], index: 3, kind: input, shape index: {}]   ;;  %s1445_s4 = inlined_call_operand.vmem [shape: bf16[128,128], index: 4, kind: input, shape index: {}]   ;;  %s1446_s5 = inlined_call_operand.vmem [shape: f32[1,128], index: 5, kind: input, shape index: {}]   ;;  %s1447_s6 = inlined_call_operand.vmem [shape: f32[128,1], index: 6, kind: input, shape index: {}]   ;;  %s1448_s7 = inlined_call_operand.hbm [shape: f32[128,128], index: 7, kind: output, shape index: {}]  }
   0x1   :  { %v72_v0 = vld [vmem:[%s1443_s2] sm:$0xf]  ;;  %v1061_v3 = vld [vmem:[%s1442_s1 + $0x8] sm:$0xff]   ;;  %v1062_v4 = vld [vmem:[%s1442_s1 + $0x10] sm:$0xff]  }
   0x2   :  { %v1060_v1 = vld [vmem:[%s1442_s1] sm:$0xff]   ;;  %1053 = vmatprep.subr.msk.bf16.mxu0 %vm138_vm0, %v72_v0  ;;  %v140_v2 = vsel %vm138_vm0, %v72_v0, 0  ;;  %v1063_v5 = vld [vmem:[%s1442_s1 + $0x18] sm:$0xff]  }
   0x3   :  { %924 = vmatpush3.bf16.msra.mxu0 %v140_v2  ;;  %925 = vmatprep.mubr.msk.bf16.mxu0 %vm113_vm1, %v1060_v1  ;;  %v1064_v6 = vld [vmem:[%s1442_s1 + $0x20] sm:$0xff]  }
   0x6   :  { %926 = vmatmul.mubr.msk.bf16.vlgmr.msra.gmra.mrb[0].mxu0 %vm113_vm1, %v1061_v3 }
   0x7   :  { %929 = vmatprep.mubr.msk.bf16.mxu0 %vm113_vm1, %v1062_v4 }
   0xe   :  { %930 = vmatmul.mubr.msk.bf16.gmra.mrb[4].mxu0 %vm113_vm1, %v1063_v5 }
   0xf   :  { %933 = vmatprep.mubr.msk.bf16.mxu0 %vm113_vm1, %v1064_v6 }
  0x10   :  { %12 = vsyncpa [#allocation3], 0  ;;  %v1065_v7 = vld [vmem:[%s1442_s1 + $0x28] sm:$0xff]   ;;  %v1066_v8 = vld [vmem:[%s1442_s1 + $0x30] sm:$0xff]   ;;  %v1100_v14 = vmov 0  }
  0x11   :  { %v1067_v9 = vld [vmem:[%s1442_s1 + $0x38] sm:$0xff]   ;;  %v1182_v10 = vld [vmem:[%s1441_s0] sm:$0xff]  ;;  %v42_v13 = vld [vmem:[%s1447_s6 + $0x10] sm:$0xff]  ;;  %1058 = vset.pattern.permute.xlu0 %v1100_v14  ;;  %1059 = vset.pattern.permute.xlu1 %v1100_v14 }
  0x12   :  { %v32_v11 = vunpack.c.l.s8.bf16 %v1182_v10  ;;  %v40_v12 = vld [vmem:[%s1447_s6] sm:$0xff]  ;;  %356 = vperm.xlu1 %1059, %v42_v13   ;;  %v41_v15 = vld [vmem:[%s1447_s6 + $0x8] sm:$0xff]  ;;  %v43_v16 = vld [vmem:[%s1447_s6 + $0x18] sm:$0xff]  ;;  %v33_v59 = vunpack.c.h.s8.bf16 %v1182_v10 }
  0x13   :  { %346 = vperm.xlu0 %1058, %v40_v12   ;;  %v44_v17 = vld [vmem:[%s1447_s6 + $0x20] sm:$0xff]  ;;  %v45_v18 = vld [vmem:[%s1447_s6 + $0x28] sm:$0xff]  ;;  %v46_v20 = vld [vmem:[%s1447_s6 + $0x30] sm:$0xff] }
  0x14   :  { %957 = vmatprep.mubr.bf16.mxu1 %v32_v11  ;;  %v1068_v19 = vld [vmem:[%s1445_s4] sm:$0xff]   ;;  %v47_v21 = vld [vmem:[%s1447_s6 + $0x38] sm:$0xff]  ;;  %v1069_v22 = vld [vmem:[%s1445_s4 + $0x8] sm:$0xff]  }
  0x15   :  { %973 = vmatprep.subr.bf16.mxu0 %v1068_v19  ;;  %v48_v23 = vld [vmem:[%s1447_s6 + $0x40] sm:$0xff]  ;;  %v49_v24 = vld [vmem:[%s1447_s6 + $0x48] sm:$0xff]  ;;  %v1070_v25 = vld [vmem:[%s1445_s4 + $0x10] sm:$0xff]  }
  0x16   :  { %934 = vmatmul.mubr.msk.bf16.gmra.mrb[8].mxu0 %vm113_vm1, %v1065_v7  ;;  %361 = vperm.xlu1 %1059, %v43_v16   ;;  %v50_v26 = vld [vmem:[%s1447_s6 + $0x50] sm:$0xff]  ;;  %v51_v27 = vld [vmem:[%s1447_s6 + $0x58] sm:$0xff]  ;;  %v52_v29 = vld [vmem:[%s1447_s6 + $0x60] sm:$0xff] }
  0x17   :  { %937 = vmatprep.mubr.msk.bf16.mxu0 %vm113_vm1, %v1066_v8  ;;  %351 = vperm.xlu0 %1058, %v41_v15   ;;  %v1071_v28 = vld [vmem:[%s1445_s4 + $0x18] sm:$0xff]   ;;  %v53_v30 = vld [vmem:[%s1447_s6 + $0x68] sm:$0xff]  ;;  %v1072_v31 = vld [vmem:[%s1445_s4 + $0x20] sm:$0xff]  }
  0x18   :  { %974 = vmatpush3.bf16.msra.mxu0 %v1068_v19  ;;  %v54_v32 = vld [vmem:[%s1447_s6 + $0x70] sm:$0xff]  ;;  %v55_v33 = vld [vmem:[%s1447_s6 + $0x78] sm:$0xff]  ;;  %v1253_v58 = vld [vmem:[%s1441_s0 + $0x8] sm:$0xff] }
  0x19   :  { %975 = vmatprep.subr.bf16.mxu0 %v1069_v22  ;;  %v34_v60 = vunpack.c.l.s8.bf16 %v1253_v58  ;;  %v1262_v61 = vld [vmem:[%s1441_s0 + $0x10] sm:$0xff]  ;;  %v35_v62 = vunpack.c.h.s8.bf16 %v1253_v58  ;;  %v1273_v0 = vld [vmem:[%s1441_s0 + $0x18] sm:$0xff]  ;;  %v1073_v4 = vld [vmem:[%s1445_s4 + $0x28] sm:$0xff]  }
  0x1a   :  { %371 = vperm.xlu1 %1059, %v45_v18   ;;  %v36_v63 = vunpack.c.l.s8.bf16 %v1262_v61  ;;  %v37_v1 = vunpack.c.h.s8.bf16 %v1262_v61  ;;  %v38_v2 = vunpack.c.l.s8.bf16 %v1273_v0  ;;  %v39_v3 = vunpack.c.h.s8.bf16 %v1273_v0  ;;  %v1074_v5 = vld [vmem:[%s1445_s4 + $0x30] sm:$0xff]   ;;  %v1075_v6 = vld [vmem:[%s1445_s4 + $0x38] sm:$0xff]   ;;  %v1395_v10 = vld [vmem:[%s1446_s5] ss:$0 sm:$0xff]  ;;  %s1101_s5 = smov [#allocation2]  }
  0x1b   :  { %366 = vperm.xlu0 %1058, %v44_v17   ;;  %v1310_v17 = vld [vmem:[%s1444_s3] ss:$0 sm:$0xff]  ;;  %s829_s1 = sshll.u32 %s1101_s5, 4  ;;  %s830_s1 = int_to_ptr.vmem [resolvable:$true] %s829_s1 }
  0x1c   :  { %976 = vmatpush3.bf16.msra.mxu0 %v1069_v22  ;;  %s1076_s24 = scalar_lea.vmem %s830_s1, 2048  ;;  %p1081_p1 = scmp.lt.s32.totalorder %s830_s1, %s830_s1 }
  0x1d   :  { %977 = vmatprep.subr.bf16.mxu0 %v1070_v25  ;;  %p1077_p0 = scmp.ne.s32.totalorder %s830_s1, %s1076_s24  ;;  %p1082_p2 = scmp.lt.s32.totalorder %s1076_s24, %s1076_s24 }
  0x1e   :  { %938 = vmatmul.mubr.msk.bf16.gmra.mrb[12].mxu0 %vm113_vm1, %v1067_v9  ;;  %381 = vperm.xlu1 %1059, %v47_v21  }
  0x1f   :  { %376 = vperm.xlu0 %1058, %v46_v20   ;;  %p1083_p3 = por %p1082_p2, %p1081_p1 }
  0x20   :  { %978 = vmatpush3.bf16.msra.mxu0 %v1070_v25 }
  0x21   :  { %979 = vmatprep.subr.bf16.mxu0 %v1071_v28  ;;  %p1084_p4 = pnand %p1083_p3, %p1077_p0 }
  0x22   :  { %391 = vperm.xlu1 %1059, %v49_v24  }
  0x23   :  { %386 = vperm.xlu0 %1058, %v48_v23  }
  0x24   :  { %980 = vmatpush3.bf16.msra.mxu0 %v1071_v28 }
  0x25   :  { %981 = vmatprep.subr.bf16.mxu0 %v1072_v31 }
  0x26   :  { %401 = vperm.xlu1 %1059, %v51_v27  }
  0x27   :  { %396 = vperm.xlu0 %1058, %v50_v26  }
  0x28   :  { %982 = vmatpush3.bf16.msra.mxu0 %v1072_v31 }
  0x29   :  { %983 = vmatprep.subr.bf16.mxu0 %v1073_v4 }
  0x2a   :  { %411 = vperm.xlu1 %1059, %v53_v30  }
  0x2b   :  { %406 = vperm.xlu0 %1058, %v52_v29  }
  0x2c   :  { %984 = vmatpush3.bf16.msra.mxu0 %v1073_v4 }
  0x2d   :  { %985 = vmatprep.subr.bf16.mxu0 %v1074_v5 }
  0x2e   :  { %421 = vperm.xlu1 %1059, %v55_v33  }
  0x2f   :  { %416 = vperm.xlu0 %1058, %v54_v32  }
  0x30   :  { %986 = vmatpush3.bf16.msra.mxu0 %v1074_v5 }
  0x31   :  { %987 = vmatprep.subr.bf16.mxu0 %v1075_v6 }
  0x34   :  { %988 = vmatpush3.bf16.msra.mxu0 %v1075_v6 }
  0x91   :  { %v1295_v8 = vpop.permute.xlu1 %356 }
  0x92   :  { %v1293_v7 = vpop.permute.xlu0 %346 }
  0x95   :  { %v1299_v12 = vpop.permute.xlu1 %361 }
  0x96   :  { %v1297_v9 = vpop.permute.xlu0 %351 }
  0x99   :  { %v1303_v14 = vpop.permute.xlu1 %371 }
  0x9a   :  { %v1301_v13 = vpop.permute.xlu0 %366 }
  0x9d   :  { %v1313_v20 = vpop.permute.xlu1 %381 }
  0x9e   :  { %v1305_v15 = vpop.permute.xlu0 %376 }
  0xa2   :  { %v1321_v30 = vpop.permute.xlu0 %386 }
  0xd9   :  { %v927_v34 = vpop.f32.mrb[0].mxu0 }
  0xda   :  { %v176_v35 = vpop.f32.mrb[1].mxu0 }
  0xdb   :  { %v928_v36 = vpop.f32.mrb[2].mxu0 }
  0xdc   :  { %v240_v37 = vpack.c.bf16 %v928_v36, %v927_v34  ;;  %v179_v38 = vpop.f32.mrb[3].mxu0  ;;  %v1324_v34 = vpop.permute.xlu1 %391 }
  0xdd   :  { %v239_v39 = vpack.c.bf16 %v179_v38, %v176_v35 }
  0xdf   :  { %941 = vmatprep.subr.bf16.mxu1 %v239_v39 }
  0xe0   :  { %942 = vmatpush3.bf16.msra.mxu1 %v239_v39 }
  0xe1   :  { %v931_v40 = vpop.f32.mrb[4].mxu0  ;;  %943 = vmatprep.subr.bf16.mxu1 %v240_v37 }
  0xe2   :  { %v192_v41 = vpop.f32.mrb[5].mxu0 }
  0xe3   :  { %v932_v42 = vpop.f32.mrb[6].mxu0 }
  0xe4   :  { %v242_v43 = vpack.c.bf16 %v932_v42, %v931_v40  ;;  %v195_v44 = vpop.f32.mrb[7].mxu0  ;;  %944 = vmatpush3.bf16.msra.mxu1 %v240_v37 }
  0xe5   :  { %v241_v45 = vpack.c.bf16 %v195_v44, %v192_v41 }
  0xe7   :  { %945 = vmatprep.subr.bf16.mxu1 %v241_v45 }
  0xe8   :  { %946 = vmatpush3.bf16.msra.mxu1 %v241_v45 }
  0xe9   :  { %v935_v46 = vpop.f32.mrb[8].mxu0  ;;  %947 = vmatprep.subr.bf16.mxu1 %v242_v43 }
  0xea   :  { %v208_v47 = vpop.f32.mrb[9].mxu0 }
  0xeb   :  { %v936_v48 = vpop.f32.mrb[10].mxu0 }
  0xec   :  { %v244_v49 = vpack.c.bf16 %v936_v48, %v935_v46  ;;  %v211_v50 = vpop.f32.mrb[11].mxu0  ;;  %948 = vmatpush3.bf16.msra.mxu1 %v242_v43 }
  0xed   :  { %v243_v51 = vpack.c.bf16 %v211_v50, %v208_v47 }
  0xef   :  { %949 = vmatprep.subr.bf16.mxu1 %v243_v51 }
  0xf0   :  { %950 = vmatpush3.bf16.msra.mxu1 %v243_v51 }
  0xf1   :  { %v939_v52 = vpop.f32.mrb[12].mxu0  ;;  %951 = vmatprep.subr.bf16.mxu1 %v244_v49 }
  0xf2   :  { %v224_v53 = vpop.f32.mrb[13].mxu0 }
  0xf3   :  { %v940_v54 = vpop.f32.mrb[14].mxu0 }
  0xf4   :  { %v246_v55 = vpack.c.bf16 %v940_v54, %v939_v52  ;;  %v227_v56 = vpop.f32.mrb[15].mxu0  ;;  %952 = vmatpush3.bf16.msra.mxu1 %v244_v49  ;;  %v1334_v49 = vpop.permute.xlu0 %396 }
  0xf5   :  { %v245_v57 = vpack.c.bf16 %v227_v56, %v224_v53 }
  0xf7   :  { %953 = vmatprep.subr.bf16.mxu1 %v245_v57 }
  0xf8   :  { %954 = vmatpush3.bf16.msra.mxu1 %v245_v57 }
  0xf9   :  { %955 = vmatprep.subr.bf16.mxu1 %v246_v55 }
  0xfc   :  { %956 = vmatpush3.bf16.msra.mxu1 %v246_v55  ;;  %v1339_v55 = vpop.permute.xlu1 %401 }
  0xff   :  { %958 = vmatmul.mubr.bf16.vlgmr.msra.gmra.mrb[0].mxu1 %v33_v59 }
 0x100   :  { %961 = vmatprep.mubr.bf16.mxu1 %v34_v60 }
 0x107   :  { %962 = vmatmul.mubr.bf16.gmra.mrb[4].mxu1 %v35_v62 }
 0x108   :  { %965 = vmatprep.mubr.bf16.mxu1 %v36_v63 }
 0x10f   :  { %966 = vmatmul.mubr.bf16.gmra.mrb[8].mxu1 %v37_v1 }
 0x110   :  { %969 = vmatprep.mubr.bf16.mxu1 %v38_v2 }
 0x117   :  { %970 = vmatmul.mubr.bf16.gmra.mrb[12].mxu1 %v39_v3 }
 0x118   :  { %1025 = vmatprep.mubr.bf16.mxu1 %v34_v60 }
 0x1d2   :  { %v959_v16 = vpop.f32.mrb[0].mxu1 }
 0x1d3   :  { %v426_v18 = vmul.f32 %v959_v16, %v1295_v8  ;;  %v281_v19 = vpop.f32.mrb[1].mxu1 }
 0x1d4   :  { %v424_v21 = vmul.f32 %v1293_v7, %v281_v19  ;;  %v960_v22 = vpop.f32.mrb[2].mxu1 }
 0x1d5   :  { %v449_v23 = vadd.f32 %v1310_v17, %v426_v18  ;;  %v427_v24 = vmul.f32 %v960_v22, %v1299_v12  ;;  %v284_v25 = vpop.f32.mrb[3].mxu1 }
 0x1d6   :  { %v447_v26 = vadd.f32 %v1310_v17, %v424_v21  ;;  %v425_v27 = vmul.f32 %v1297_v9, %v284_v25  ;;  %v1345_v21 = vpop.permute.xlu0 %406 }
 0x1d7   :  { %v465_v28 = vmax.f32 %v449_v23, 0.0  ;;  %v450_v29 = vadd.f32 %v1310_v17, %v427_v24 }
 0x1d8   :  { %v463_v31 = vmax.f32 %v447_v26, 0.0  ;;  %v448_v32 = vadd.f32 %v1310_v17, %v425_v27 }
 0x1d9   :  { %v466_v33 = vmax.f32 %v450_v29, 0.0  ;;  %v481_v37 = vmul.f32 %v465_v28, %v1295_v8 }
 0x1da   :  { %v464_v35 = vmax.f32 %v448_v32, 0.0  ;;  %v963_v36 = vpop.f32.mrb[4].mxu1  ;;  %v479_v41 = vmul.f32 %v463_v31, %v1293_v7  ;;  %v1352_v31 = vpop.permute.xlu1 %411 }
 0x1db   :  { %v482_v38 = vmul.f32 %v466_v33, %v1299_v12  ;;  %v430_v39 = vmul.f32 %v963_v36, %v1305_v15  ;;  %v297_v40 = vpop.f32.mrb[5].mxu1 }
 0x1dc   :  { %v480_v42 = vmul.f32 %v464_v35, %v1297_v9  ;;  %v428_v43 = vmul.f32 %v1301_v13, %v297_v40  ;;  %v964_v44 = vpop.f32.mrb[6].mxu1 }
 0x1dd   :  { %v496_v45 = vpack.c.bf16 %v482_v38, %v481_v37  ;;  %v453_v46 = vadd.f32 %v1310_v17, %v430_v39  ;;  %v431_v47 = vmul.f32 %v964_v44, %v1313_v20  ;;  %v300_v48 = vpop.f32.mrb[7].mxu1 }
 0x1de   :  { %v451_v50 = vadd.f32 %v1310_v17, %v428_v43  ;;  %v429_v51 = vmul.f32 %v1303_v14, %v300_v48  ;;  %v495_v52 = vpack.c.bf16 %v480_v42, %v479_v41  ;;  %v1358_v41 = vpop.permute.xlu0 %416  ;;  %v1363_v48 = vpop.permute.xlu1 %421 }
 0x1df   :  { %v469_v53 = vmax.f32 %v453_v46, 0.0  ;;  %v454_v54 = vadd.f32 %v1310_v17, %v431_v47 }
 0x1e0   :  { %v467_v56 = vmax.f32 %v451_v50, 0.0  ;;  %v452_v57 = vadd.f32 %v1310_v17, %v429_v51  ;;  %989 = vmatprep.mubr.bf16.mxu0 %v495_v52 }
 0x1e1   :  { %v470_v60 = vmax.f32 %v454_v54, 0.0  ;;  %990 = vmatmul.mubr.bf16.vlgmr.msra.gmra.mrb[16].mxu0 %v496_v45  ;;  %v485_v6 = vmul.f32 %v469_v53, %v1305_v15 }
 0x1e2   :  { %v468_v4 = vmax.f32 %v452_v57, 0.0  ;;  %v967_v5 = vpop.f32.mrb[8].mxu1  ;;  %v483_v22 = vmul.f32 %v467_v56, %v1301_v13 }
 0x1e3   :  { %v486_v16 = vmul.f32 %v470_v60, %v1313_v20  ;;  %v434_v18 = vmul.f32 %v967_v5, %v1334_v49  ;;  %v313_v19 = vpop.f32.mrb[9].mxu1 }
 0x1e4   :  { %v484_v23 = vmul.f32 %v468_v4, %v1303_v14  ;;  %v432_v24 = vmul.f32 %v1321_v30, %v313_v19  ;;  %v968_v25 = vpop.f32.mrb[10].mxu1 }
 0x1e5   :  { %v457_v26 = vadd.f32 %v1310_v17, %v434_v18  ;;  %v435_v27 = vmul.f32 %v968_v25, %v1339_v55  ;;  %v316_v28 = vpop.f32.mrb[11].mxu1  ;;  %v498_v29 = vpack.c.bf16 %v486_v16, %v485_v6 }
 0x1e6   :  { %v455_v32 = vadd.f32 %v1310_v17, %v432_v24  ;;  %v433_v33 = vmul.f32 %v1324_v34, %v316_v28  ;;  %v497_v35 = vpack.c.bf16 %v484_v23, %v483_v22 }
 0x1e7   :  { %v473_v36 = vmax.f32 %v457_v26, 0.0  ;;  %v458_v37 = vadd.f32 %v1310_v17, %v435_v27 }
 0x1e8   :  { %v471_v38 = vmax.f32 %v455_v32, 0.0  ;;  %v456_v39 = vadd.f32 %v1310_v17, %v433_v33  ;;  %993 = vmatprep.mubr.bf16.mxu0 %v497_v35 }
 0x1e9   :  { %v474_v40 = vmax.f32 %v458_v37, 0.0  ;;  %994 = vmatmul.mubr.bf16.gmra.mrb[20].mxu0 %v498_v29  ;;  %v489_v44 = vmul.f32 %v473_v36, %v1334_v49 }
 0x1ea   :  { %v472_v42 = vmax.f32 %v456_v39, 0.0  ;;  %v971_v43 = vpop.f32.mrb[12].mxu1  ;;  %v487_v50 = vmul.f32 %v471_v38, %v1321_v30 }
 0x1eb   :  { %v490_v45 = vmul.f32 %v474_v40, %v1339_v55  ;;  %v438_v46 = vmul.f32 %v971_v43, %v1358_v41  ;;  %v329_v47 = vpop.f32.mrb[13].mxu1 }
 0x1ec   :  { %v488_v51 = vmul.f32 %v472_v42, %v1324_v34  ;;  %v436_v52 = vmul.f32 %v1345_v21, %v329_v47  ;;  %v972_v53 = vpop.f32.mrb[14].mxu1 }
 0x1ed   :  { %v461_v54 = vadd.f32 %v1310_v17, %v438_v46  ;;  %v439_v56 = vmul.f32 %v972_v53, %v1363_v48  ;;  %v332_v57 = vpop.f32.mrb[15].mxu1  ;;  %v500_v60 = vpack.c.bf16 %v490_v45, %v489_v44 }
 0x1ee   :  { %v459_v4 = vadd.f32 %v1310_v17, %v436_v52  ;;  %v437_v5 = vmul.f32 %v1352_v31, %v332_v57  ;;  %v499_v6 = vpack.c.bf16 %v488_v51, %v487_v50 }
 0x1ef   :  { %v477_v16 = vmax.f32 %v461_v54, 0.0  ;;  %v462_v18 = vadd.f32 %v1310_v17, %v439_v56 }
 0x1f0   :  { %v475_v19 = vmax.f32 %v459_v4, 0.0  ;;  %v460_v22 = vadd.f32 %v1310_v17, %v437_v5  ;;  %997 = vmatprep.mubr.bf16.mxu0 %v499_v6 }
 0x1f1   :  { %v478_v23 = vmax.f32 %v462_v18, 0.0  ;;  %998 = vmatmul.mubr.bf16.gmra.mrb[24].mxu0 %v500_v60  ;;  %v493_v25 = vmul.f32 %v477_v16, %v1358_v41 }
 0x1f2   :  { %v476_v24 = vmax.f32 %v460_v22, 0.0  ;;  %v491_v27 = vmul.f32 %v475_v19, %v1345_v21 }
 0x1f3   :  { %v494_v26 = vmul.f32 %v478_v23, %v1363_v48 }
 0x1f4   :  { %v492_v28 = vmul.f32 %v476_v24, %v1352_v31 }
 0x1f5   :  { %v502_v29 = vpack.c.bf16 %v494_v26, %v493_v25 }
 0x1f6   :  { %v501_v32 = vpack.c.bf16 %v492_v28, %v491_v27 }
 0x1f8   :  { %1001 = vmatprep.mubr.bf16.mxu0 %v501_v32 }
 0x1f9   :  { %1002 = vmatmul.mubr.bf16.gmra.mrb[28].mxu0 %v502_v29 }
 0x1fa   :  { %1021 = vmatprep.mubr.bf16.mxu0 %v32_v11 }
 0x2b4   :  { %v991_v17 = vpop.f32.mrb[16].mxu0 }
 0x2b5   :  { %v601_v33 = vpop.f32.mrb[17].mxu0 }
 0x2b6   :  { %v992_v35 = vpop.f32.mrb[18].mxu0 }
 0x2b7   :  { %v665_v36 = vpack.c.bf16 %v992_v35, %v991_v17  ;;  %v604_v37 = vpop.f32.mrb[19].mxu0 }
 0x2b8   :  { %v664_v38 = vpack.c.bf16 %v604_v37, %v601_v33 }
 0x2ba   :  { %1005 = vmatprep.subr.bf16.mxu0 %v664_v38  ;;  %1037 = vmatprep.subr.bf16.mxu1 %v664_v38 }
 0x2bb   :  { %1006 = vmatpush3.bf16.msra.mxu0 %v664_v38  ;;  %1045 = vmatpush3.bf16.msra.mxu1 %v664_v38 }
 0x2bc   :  { %v995_v39 = vpop.f32.mrb[20].mxu0  ;;  %1007 = vmatprep.subr.bf16.mxu0 %v665_v36  ;;  %1038 = vmatprep.subr.bf16.mxu1 %v665_v36 }
 0x2bd   :  { %v617_v40 = vpop.f32.mrb[21].mxu0 }
 0x2be   :  { %v996_v42 = vpop.f32.mrb[22].mxu0 }
 0x2bf   :  { %v667_v43 = vpack.c.bf16 %v996_v42, %v995_v39  ;;  %v620_v44 = vpop.f32.mrb[23].mxu0  ;;  %1008 = vmatpush3.bf16.msra.mxu0 %v665_v36  ;;  %1046 = vmatpush3.bf16.msra.mxu1 %v665_v36 }
 0x2c0   :  { %v666_v11 = vpack.c.bf16 %v620_v44, %v617_v40 }
 0x2c2   :  { %1009 = vmatprep.subr.bf16.mxu0 %v666_v11  ;;  %1039 = vmatprep.subr.bf16.mxu1 %v666_v11 }
 0x2c3   :  { %1010 = vmatpush3.bf16.msra.mxu0 %v666_v11  ;;  %1047 = vmatpush3.bf16.msra.mxu1 %v666_v11 }
 0x2c4   :  { %v999_v45 = vpop.f32.mrb[24].mxu0  ;;  %1011 = vmatprep.subr.bf16.mxu0 %v667_v43  ;;  %1040 = vmatprep.subr.bf16.mxu1 %v667_v43 }
 0x2c5   :  { %v633_v46 = vpop.f32.mrb[25].mxu0 }
 0x2c6   :  { %v1000_v47 = vpop.f32.mrb[26].mxu0 }
 0x2c7   :  { %v669_v50 = vpack.c.bf16 %v1000_v47, %v999_v45  ;;  %v636_v51 = vpop.f32.mrb[27].mxu0  ;;  %1012 = vmatpush3.bf16.msra.mxu0 %v667_v43  ;;  %1048 = vmatpush3.bf16.msra.mxu1 %v667_v43 }
 0x2c8   :  { %v668_v52 = vpack.c.bf16 %v636_v51, %v633_v46 }
 0x2ca   :  { %1013 = vmatprep.subr.bf16.mxu0 %v668_v52  ;;  %1041 = vmatprep.subr.bf16.mxu1 %v668_v52 }
 0x2cb   :  { %1014 = vmatpush3.bf16.msra.mxu0 %v668_v52  ;;  %1049 = vmatpush3.bf16.msra.mxu1 %v668_v52 }
 0x2cc   :  { %v1003_v53 = vpop.f32.mrb[28].mxu0  ;;  %1015 = vmatprep.subr.bf16.mxu0 %v669_v50  ;;  %1042 = vmatprep.subr.bf16.mxu1 %v669_v50 }
 0x2cd   :  { %v649_v54 = vpop.f32.mrb[29].mxu0 }
 0x2ce   :  { %v1004_v56 = vpop.f32.mrb[30].mxu0 }
 0x2cf   :  { %v671_v57 = vpack.c.bf16 %v1004_v56, %v1003_v53  ;;  %v652_v60 = vpop.f32.mrb[31].mxu0  ;;  %1016 = vmatpush3.bf16.msra.mxu0 %v669_v50  ;;  %1050 = vmatpush3.bf16.msra.mxu1 %v669_v50 }
 0x2d0   :  { %v670_v4 = vpack.c.bf16 %v652_v60, %v649_v54 }
 0x2d2   :  { %1017 = vmatprep.subr.bf16.mxu0 %v670_v4  ;;  %1043 = vmatprep.subr.bf16.mxu1 %v670_v4 }
 0x2d3   :  { %1018 = vmatpush3.bf16.msra.mxu0 %v670_v4  ;;  %1051 = vmatpush3.bf16.msra.mxu1 %v670_v4 }
 0x2d4   :  { %1019 = vmatprep.subr.bf16.mxu0 %v671_v57  ;;  %1044 = vmatprep.subr.bf16.mxu1 %v671_v57 }
 0x2d7   :  { %1020 = vmatpush3.bf16.msra.mxu0 %v671_v57  ;;  %1052 = vmatpush3.bf16.msra.mxu1 %v671_v57 }
 0x2da   :  { %1022 = vmatmul.mubr.bf16.vlgmr.msra.gmra.mrb[32].mxu0 %v33_v59  ;;  %1026 = vmatmul.mubr.bf16.vlgmr.msra.gmra.mrb[16].mxu1 %v35_v62 }
 0x2db   :  { %1029 = vmatprep.mubr.bf16.mxu1 %v36_v63 }
 0x2e2   :  { %1030 = vmatmul.mubr.bf16.gmra.mrb[20].mxu1 %v37_v1 }
 0x2e3   :  { %1033 = vmatprep.mubr.bf16.mxu1 %v38_v2 }
 0x2ea   :  { %1034 = vmatmul.mubr.bf16.gmra.mrb[24].mxu1 %v39_v3 }
 0x3ad   :  { %v1023_v5 = vpop.f32.mrb[32].mxu0  ;;  %v1027_v58 = vpop.f32.mrb[16].mxu1 }
 0x3ae   :  { %v771_v59 = vmul.f32 %v1023_v5, %v1295_v8  ;;  %v775_v62 = vmul.f32 %v1027_v58, %v1305_v15  ;;  %v706_v63 = vpop.f32.mrb[33].mxu0  ;;  %v722_v61 = vpop.f32.mrb[17].mxu1 }
 0x3af   :  { %v769_v1 = vmul.f32 %v706_v63, %v1293_v7  ;;  %v773_v2 = vmul.f32 %v722_v61, %v1301_v13  ;;  %v1024_v6 = vpop.f32.mrb[34].mxu0  ;;  %v1028_v0 = vpop.f32.mrb[18].mxu1 }
 0x3b0   :  { %v794_v3 = vadd.f32 %v1395_v10, %v771_v59  ;;  %v798_v16 = vadd.f32 %v1395_v10, %v775_v62  ;;  %v772_v18 = vmul.f32 %v1024_v6, %v1299_v12  ;;  %v776_v19 = vmul.f32 %v1028_v0, %v1313_v20  ;;  %v709_v22 = vpop.f32.mrb[35].mxu0  ;;  %v725_v8 = vpop.f32.mrb[19].mxu1 }
 0x3b1   :  { %v792_v15 = vadd.f32 %v1395_v10, %v769_v1  ;;  %v796_v23 = vadd.f32 %v1395_v10, %v773_v2  ;;  %v770_v7 = vmul.f32 %v709_v22, %v1297_v9  ;;  %v774_v13 = vmul.f32 %v725_v8, %v1303_v14 }
 0x3b2   :  { %810 = vst [vmem:[#allocation2 + $0x10] sm:$0xff] %v794_v3  ;;  %814 = vst [vmem:[#allocation2 + $0x30] sm:$0xff] %v798_v16  ;;  %v795_v24 = vadd.f32 %v1395_v10, %v772_v18  ;;  %v799_v25 = vadd.f32 %v1395_v10, %v776_v19 }
 0x3b3   :  { %808 = vst [vmem:[#allocation2] sm:$0xff] %v792_v15  ;;  %812 = vst [vmem:[#allocation2 + $0x20] sm:$0xff] %v796_v23  ;;  %v793_v12 = vadd.f32 %v1395_v10, %v770_v7  ;;  %v797_v20 = vadd.f32 %v1395_v10, %v774_v13 }
 0x3b4   :  { %811 = vst [vmem:[#allocation2 + $0x18] sm:$0xff] %v795_v24  ;;  %815 = vst [vmem:[#allocation2 + $0x38] sm:$0xff] %v799_v25 }
 0x3b5   :  { %809 = vst [vmem:[#allocation2 + $0x8] sm:$0xff] %v793_v12  ;;  %813 = vst [vmem:[#allocation2 + $0x28] sm:$0xff] %v797_v20  ;;  %v1031_v26 = vpop.f32.mrb[20].mxu1 }
 0x3b6   :  { %v779_v9 = vmul.f32 %v1031_v26, %v1334_v49  ;;  %v738_v14 = vpop.f32.mrb[21].mxu1 }
 0x3b7   :  { %v777_v27 = vmul.f32 %v738_v14, %v1321_v30  ;;  %v1032_v28 = vpop.f32.mrb[22].mxu1 }
 0x3b8   :  { %v802_v29 = vadd.f32 %v1395_v10, %v779_v9  ;;  %v780_v32 = vmul.f32 %v1032_v28, %v1339_v55  ;;  %v741_v17 = vpop.f32.mrb[23].mxu1 }
 0x3b9   :  { %v800_v33 = vadd.f32 %v1395_v10, %v777_v27  ;;  %v778_v35 = vmul.f32 %v741_v17, %v1324_v34 }
 0x3ba   :  { %818 = vst [vmem:[#allocation2 + $0x50] sm:$0xff] %v802_v29  ;;  %v803_v36 = vadd.f32 %v1395_v10, %v780_v32 }
 0x3bb   :  { %816 = vst [vmem:[#allocation2 + $0x40] sm:$0xff] %v800_v33  ;;  %v801_v37 = vadd.f32 %v1395_v10, %v778_v35 }
 0x3bc   :  { %819 = vst [vmem:[#allocation2 + $0x58] sm:$0xff] %v803_v36 }
 0x3bd   :  { %817 = vst [vmem:[#allocation2 + $0x48] sm:$0xff] %v801_v37  ;;  %v1035_v49 = vpop.f32.mrb[24].mxu1 }
 0x3be   :  { %v783_v30 = vmul.f32 %v1035_v49, %v1358_v41  ;;  %v754_v38 = vpop.f32.mrb[25].mxu1 }
 0x3bf   :  { %v781_v39 = vmul.f32 %v754_v38, %v1345_v21  ;;  %v1036_v55 = vpop.f32.mrb[26].mxu1 }
 0x3c0   :  { %v806_v40 = vadd.f32 %v1395_v10, %v783_v30  ;;  %v784_v34 = vmul.f32 %v1036_v55, %v1363_v48  ;;  %v757_v42 = vpop.f32.mrb[27].mxu1 }
 0x3c1   :  { %v804_v43 = vadd.f32 %v1395_v10, %v781_v39  ;;  %v782_v44 = vmul.f32 %v757_v42, %v1352_v31 }
 0x3c2   :  { %822 = vst [vmem:[#allocation2 + $0x70] sm:$0xff] %v806_v40  ;;  %v807_v11 = vadd.f32 %v1395_v10, %v784_v34 }
 0x3c3   :  { %820 = vst [vmem:[#allocation2 + $0x60] sm:$0xff] %v804_v43  ;;  %v805_v41 = vadd.f32 %v1395_v10, %v782_v44 }
 0x3c4   :  { %823 = vst [vmem:[#allocation2 + $0x78] sm:$0xff] %v807_v11 }
 0x3c5   :  { %821 = vst [vmem:[#allocation2 + $0x68] sm:$0xff] %v805_v41 }
 0x3c6   :  { %1087 = shalt.err (!%p1084_p4)
}
 0x3c7   :  { %s1088_s27 = scalar_lea.hbm %s1448_s7, 2048 }
 0x3c8   :  { %p1089_p5 = scmp.ne.s32.totalorder %s1448_s7, %s1088_s27  ;;  %p1092_p6 = scmp.lt.u32.totalorder %s1088_s27, %s1448_s7 }
 0x3ca   :  { %p1094_p7 = pnand %p1092_p6, %p1089_p5 }
 0x3cc   :  { %1097 = shalt.err (!%p1094_p7)
}
 0x3cd   :  { %s1102_s2 = smov 128   ;;  %s1103_s9 = smov 8  }
 0x3ce   :  { %835 = dma.vmem_to_hbm [thread:$0]  %s830_s1, 2048, %s1448_s7, [#allocation3], %s1102_s2, %s1102_s2, %s1103_s9  }
 0x3cf   :  { %1098 = dma.done.wait [#allocation3], 2048  }
 0x3d0   :  { %1099 = vsyncadd [#allocation3], 4294965248 }
 0x3d1   :  { %839 = vsyncpa [#allocation3], 1 }

</bundles_post_ra>
